<compile_context>
chip_gen: v5e
topology: v5e:2x2
jax: 0.10.0
libtpu: 0.0.40
codegen_flags: <defaults>
</compile_context>

<pallas_src>
import functools

import jax
import jax.numpy as jnp
import numpy as np
from jax.experimental import pallas as pl
from jax.experimental.pallas import tpu as pltpu


def _round_up(x, m):
    return (x + m - 1) // m * m


def _sublane(itemsize):
    # Native (sublane, lane) tile: f32 -> (8,128), bf16 -> (16,128), int8 -> (32,128).
    return 8 * max(1, 4 // max(1, itemsize))


def classifier_kernel(x_ref, w_ref, b_ref, o_ref, acc_ref, *,
                      hw_total, t_hw, mask_spatial):
    # x_ref: (TN, C, t_hw)  w_ref: (C, Kpad)  b_ref: (1, Kpad)
    # o_ref: (TN, Kpad)     acc_ref: (TN, C) f32 pooled-sum accumulator
    j = pl.program_id(1)

    @pl.when(j == 0)
    def _init():
        acc_ref[...] = jnp.zeros_like(acc_ref)

    x = x_ref[...]
    if mask_spatial:
        # Ragged spatial chunk: zero the out-of-range lanes before reducing.
        pos = j * t_hw + jax.lax.broadcasted_iota(jnp.int32, x.shape, x.ndim - 1)
        x = jnp.where(pos < hw_total, x, jnp.zeros_like(x))

    # Upcast fused into the reduce: no full-tile f32 temp is materialized.
    acc_ref[...] += jnp.sum(x, axis=-1, dtype=jnp.float32)

    @pl.when(j == pl.num_programs(1) - 1)
    def _finalize():
        pooled = acc_ref[...].astype(w_ref.dtype)   # native bf16 MXU path for bf16 models
        out = jnp.dot(pooled, w_ref[...], preferred_element_type=jnp.float32)
        o_ref[...] = (out + b_ref[...].astype(jnp.float32)).astype(o_ref.dtype)


def classifier_forward(x_nchw, weight, bias, *, tn_max=1024):
    """AdaptiveAvgPool2d((1,1)) -> flatten -> Linear.
    x_nchw: (N, C, H, W); weight: (K, C) as in nn.Linear; bias: (K,)."""
    N, C, H, W = x_nchw.shape
    K = weight.shape[0]
    HW = H * W

    # ---- layout plumbing (no HBM-rewriting transpose) -----------------------
    x_3d = x_nchw.reshape(N, C, HW)                 # contiguous merge -> free
    x_it = x_3d.dtype.itemsize
    out_dtype = x_3d.dtype
    out_it = out_dtype.itemsize

    # Lane-dense output: pad classes to a multiple of 128 (padded cols are zero).
    k_pad = _round_up(K, 128)
    inv_hw = 1.0 / float(HW)
    # Fold 1/HW into the weight (mean @ W^T == sum @ (W^T/HW)); keep model dtype.
    w_ck = jnp.pad((weight.T * inv_hw).astype(weight.dtype),
                   ((0, 0), (0, k_pad - K)))        # (C, Kpad)
    b_1k = jnp.pad(bias.reshape(1, K), ((0, 0), (0, k_pad - K)))
    w_it = w_ck.dtype.itemsize

    # ---- per-generation VMEM budget -----------------------------------------
    try:
        vmem_cap = int(pltpu.get_tpu_info().vmem_capacity_bytes)
    except Exception:
        vmem_cap = 64 * 1024 * 1024                 # v7x-safe fallback
    # ~96 MiB on v5e/v6e (128 MiB physical), ~48 MiB on v7x (64 MiB physical).
    vmem_limit = int(min(vmem_cap * 3 // 4, 100 * 1024 * 1024))

    # ---- VMEM accounting against padded layout + double-buffering -----------
    c_pad_x = _round_up(C, _sublane(x_it))
    w_bytes = 2 * _round_up(C, _sublane(w_it)) * k_pad * w_it   # resident weight (x2 safety)
    b_bytes = 2 * _sublane(w_it) * k_pad * w_it                 # resident bias
    budget = max(vmem_limit - (w_bytes + b_bytes) - (2 << 20), 2 << 20)

    def per_row_bytes(t_hw):
        x_b = 2 * c_pad_x * _round_up(t_hw, 128) * x_it   # double-buffered x tile
        o_b = 2 * k_pad * out_it                          # double-buffered out tile
        a_b = _round_up(C, 128) * 4                       # f32 pooled accumulator
        return x_b + o_b + a_b

    # Spatial chunking only if even an 8-row tile of the full HW does not fit.
    t_hw = HW
    if 8 * per_row_bytes(HW) > budget and HW > 128:
        fixed_row = 2 * k_pad * out_it + _round_up(C, 128) * 4
        lanes = (budget // 8 - fixed_row) // (2 * c_pad_x * x_it)
        t_hw = max(128, (lanes // 128) * 128)
        if t_hw >= HW:
            t_hw = HW
    # TODO(synk): no channel (C) tiling path; only needed for absurdly large C
    # where even (8, C, 128) tiles exceed the VMEM budget.

    tn = max(8, min(int(budget // per_row_bytes(t_hw)) // 8 * 8, tn_max))
    if N > 8:
        # Keep >= 2 batch grid steps so v7x's two TensorCores both get work.
        tn = min(tn, _round_up(pl.cdiv(N, 2), 8))
    if tn >= N:
        tn = N                                       # single full block, no ragged rows

    n_tiles = pl.cdiv(N, tn)                         # ragged last block: OOB stores masked
    hw_tiles = pl.cdiv(HW, t_hw)
    mask_spatial = (hw_tiles > 1) and (HW % t_hw != 0)

    kernel = functools.partial(classifier_kernel, hw_total=HW, t_hw=t_hw,
                               mask_spatial=mask_spatial)

    cost = pl.CostEstimate(
        flops=2 * N * C * k_pad + N * C * HW,
        transcendentals=0,
        bytes_accessed=(N * C * HW * x_it + C * k_pad * w_it + k_pad * w_it
                        + N * k_pad * out_it),
    )

    out = pl.pallas_call(
        kernel,
        out_shape=jax.ShapeDtypeStruct((N, k_pad), out_dtype),
        grid=(n_tiles, hw_tiles),
        in_specs=[
            pl.BlockSpec((tn, C, t_hw), lambda i, j: (i, 0, j)),   # streamed activations
            pl.BlockSpec((C, k_pad), lambda i, j: (0, 0)),         # VMEM-resident weight
            pl.BlockSpec((1, k_pad), lambda i, j: (0, 0)),         # VMEM-resident bias
        ],
        out_specs=pl.BlockSpec((tn, k_pad), lambda i, j: (i, 0)),
        scratch_shapes=[pltpu.VMEM((tn, C), jnp.float32)],
        compiler_params=pltpu.CompilerParams(
            dimension_semantics=("parallel", "arbitrary"),
            vmem_limit_bytes=vmem_limit,
        ),
        cost_estimate=cost,
    )(x_3d, w_ck, b_1k)

    return out[:, :K]


if __name__ == "__main__":
    # Small shapes consistent with the module's forward.
    N, C, H, W = 2, 4, 16, 16
    num_classes = 8

    key = jax.random.PRNGKey(0)
    kx, kw, kb = jax.random.split(key, 3)
    x = jax.random.normal(kx, (N, C, H, W), dtype=jnp.float32)
    # Deterministic params (shapes from nn.Linear(in_channels, num_classes)).
    weight = jax.random.normal(kw, (num_classes, C), dtype=jnp.float32) * 0.1
    bias = jax.random.normal(kb, (num_classes,), dtype=jnp.float32) * 0.1

    out = classifier_forward(x, weight, bias)
    out = jax.block_until_ready(out)

    # Pure-JAX reference of the PyTorch forward.
    pooled_ref = jnp.mean(x, axis=(2, 3))                     # (N, C)
    ref = pooled_ref @ weight.T + bias                        # (N, K)
    np.testing.assert_allclose(np.asarray(out), np.asarray(ref),
                               rtol=1e-5, atol=1e-5)

    print("KERNEL_OK")
</pallas_src>

<mosaic_0001>
module attributes {stable_mosaic.version = 11 : i64} {
  func.func @classifier_kernel(%arg0: i32, %arg1: i32, %arg2: memref<2x4x256xf32, #tpu.memory_space<vmem>>, %arg3: memref<4x128xf32, #tpu.memory_space<vmem>>, %arg4: memref<1x128xf32, #tpu.memory_space<vmem>>, %arg5: memref<2x128xf32, #tpu.memory_space<vmem>>, %arg6: memref<2x4xf32, #tpu.memory_space<vmem>>) attributes {dimension_semantics = [#tpu.dimension_semantics<parallel>, #tpu.dimension_semantics<arbitrary>], iteration_bounds = array<i64: 1, 1>, scalar_prefetch = 0 : i64, scratch_operands = 1 : i64, tpu.core_type = #tpu.core_type<tc>, window_params = [{transform_indices = @transform_0, window_bounds = array<i64: 2, 4, 256>}, {pipeline_mode = #tpu.pipeline_mode<synchronous>, transform_indices = @transform_1, window_bounds = array<i64: 4, 128>}, {pipeline_mode = #tpu.pipeline_mode<synchronous>, transform_indices = @transform_2, window_bounds = array<i64: 1, 128>}, {transform_indices = @transform_3, window_bounds = array<i64: 2, 128>}]} {
    %c0_i32 = arith.constant 0 : i32
    %0 = arith.cmpi eq, %arg1, %c0_i32 : i32
    %1 = arith.extui %0 : i1 to i32
    %c0_i32_0 = arith.constant 0 : i32
    %2 = arith.cmpi ne, %1, %c0_i32_0 : i32
    scf.if %2 {
      %cst_9 = arith.constant 0.000000e+00 : f32
      %11 = vector.broadcast %cst_9 : f32 to vector<2x4xf32>
      %c0_10 = arith.constant 0 : index
      %c0_11 = arith.constant 0 : index
      %12 = vector.load %arg6[%c0_10, %c0_11] : memref<2x4xf32, #tpu.memory_space<vmem>>, vector<2x4xf32>
      tpu.vector_store %arg6[%c0_10, %c0_11], %11 {strides = array<i32>} : memref<2x4xf32, #tpu.memory_space<vmem>>, vector<2x4xf32>,
    } else {
    }
    %c0 = arith.constant 0 : index
    %c0_1 = arith.constant 0 : index
    %c0_2 = arith.constant 0 : index
    %3 = vector.load %arg2[%c0, %c0_1, %c0_2] : memref<2x4x256xf32, #tpu.memory_space<vmem>>, vector<2x4x256xf32>
    %c0_3 = arith.constant 0 : index
    %c0_4 = arith.constant 0 : index
    %4 = vector.load %arg6[%c0_3, %c0_4] : memref<2x4xf32, #tpu.memory_space<vmem>>, vector<2x4xf32>
    %cst = arith.constant dense<0.000000e+00> : vector<2x4xf32>
    %5 = vector.multi_reduction <add>, %3, %cst [2] : vector<2x4x256xf32> to vector<2x4xf32>
    %6 = arith.addf %4, %5 : vector<2x4xf32>
    %c0_5 = arith.constant 0 : index
    %c0_6 = arith.constant 0 : index
    %7 = vector.load %arg6[%c0_5, %c0_6] : memref<2x4xf32, #tpu.memory_space<vmem>>, vector<2x4xf32>
    tpu.vector_store %arg6[%c0_5, %c0_6], %6 {strides = array<i32>} : memref<2x4xf32, #tpu.memory_space<vmem>>, vector<2x4xf32>,
    %c0_i32_7 = arith.constant 0 : i32
    %8 = arith.cmpi eq, %arg1, %c0_i32_7 : i32
    %9 = arith.extui %8 : i1 to i32
    %c0_i32_8 = arith.constant 0 : i32
    %10 = arith.cmpi ne, %9, %c0_i32_8 : i32
    scf.if %10 {
      %c0_9 = arith.constant 0 : index
      %c0_10 = arith.constant 0 : index
      %11 = vector.load %arg6[%c0_9, %c0_10] : memref<2x4xf32, #tpu.memory_space<vmem>>, vector<2x4xf32>
      %c0_11 = arith.constant 0 : index
      %c0_12 = arith.constant 0 : index
      %12 = vector.load %arg3[%c0_11, %c0_12] : memref<4x128xf32, #tpu.memory_space<vmem>>, vector<4x128xf32>
      %cst_13 = arith.constant dense<0.000000e+00> : vector<2x128xf32>
      %13 = tpu.matmul %11, %12, %cst_13 {dimension_numbers = #tpu.dot_dimension_numbers<[1], [0], [0], [1], [0, 0, 1, 1], [], []>} : vector<2x4xf32>, vector<4x128xf32>, vector<2x128xf32> -> vector<2x128xf32>
      %c0_14 = arith.constant 0 : index
      %c0_15 = arith.constant 0 : index
      %14 = vector.load %arg4[%c0_14, %c0_15] : memref<1x128xf32, #tpu.memory_space<vmem>>, vector<1x128xf32>
      %15 = vector.broadcast %14 : vector<1x128xf32> to vector<2x128xf32>
      %16 = arith.addf %13, %15 : vector<2x128xf32>
      %c0_16 = arith.constant 0 : index
      %c0_17 = arith.constant 0 : index
      %17 = vector.load %arg5[%c0_16, %c0_17] : memref<2x128xf32, #tpu.memory_space<vmem>>, vector<2x128xf32>
      tpu.vector_store %arg5[%c0_16, %c0_17], %16 {strides = array<i32>} : memref<2x128xf32, #tpu.memory_space<vmem>>, vector<2x128xf32>,
    } else {
    }
    return
  }
  func.func @transform_0(%arg0: i32, %arg1: i32) -> (i32, i32, i32) {
    %c0_i32 = arith.constant 0 : i32
    %c0_i32_0 = arith.constant 0 : i32
    return %arg0, %c0_i32, %arg1 : i32, i32, i32
  }
  func.func @transform_1(%arg0: i32, %arg1: i32) -> (i32, i32) {
    %c0_i32 = arith.constant 0 : i32
    %c0_i32_0 = arith.constant 0 : i32
    %c0_i32_1 = arith.constant 0 : i32
    return %c0_i32, %c0_i32_0 : i32, i32
  }
  func.func @transform_2(%arg0: i32, %arg1: i32) -> (i32, i32) {
    %c0_i32 = arith.constant 0 : i32
    %c0_i32_0 = arith.constant 0 : i32
    %c0_i32_1 = arith.constant 0 : i32
    return %c0_i32, %c0_i32_0 : i32, i32
  }
  func.func @transform_3(%arg0: i32, %arg1: i32) -> (i32, i32) {
    %c0_i32 = arith.constant 0 : i32
    %c0_i32_0 = arith.constant 0 : i32
    return %arg0, %c0_i32 : i32, i32
  }
}

</mosaic_0001>

<bundles_post_ra>
// kernel: tpu_custom_call.1
= control target key start
LH: loop header
LB: loop body
LE: loop exit
PB: predicated region body
PF: predicated region fallthrough
CT: control target
= control target key end

     0   :  { %8 = vsyncpa [#allocation4], 0  ;;  %s275_s0 = inlined_call_operand.hbm [shape: f32[2,4,256], index: 0, kind: input, shape index: {}]   ;;  %s276_s1 = inlined_call_operand.hbm [shape: f32[4,128], index: 1, kind: input, shape index: {}]   ;;  %s277_s2 = inlined_call_operand.vmem [shape: f32[1,128], index: 2, kind: input, shape index: {}]   ;;  %s278_s3 = inlined_call_operand.hbm [shape: f32[2,128], index: 3, kind: output, shape index: {}]  }
   0x1   :  { %9 = vsyncpa [#allocation7], 0 }
   0x2   :  { %10 = vsyncpa [#allocation5], 0  ;;  %s15_s14 = sshll.u32 %s275_s0, 4  ;;  %s232_s15 = smov [#allocation3]   ;;  %s16_s14 = int_to_ptr.hbm [resolvable:$true] %s15_s14 }
   0x3   :  { %s17_s16 = sshll.u32 %s232_s15, 4  ;;  %s29_s19 = sshll.u32 %s276_s1, 4  ;;  %s18_s16 = int_to_ptr.vmem [resolvable:$true] %s17_s16  ;;  %s30_s19 = int_to_ptr.hbm [resolvable:$true] %s29_s19 }
   0x4   :  { %s233_s20 = smov 128   ;;  %s234_s21 = smov 8  }
   0x5   :  { %23 = dma.hbm_to_vmem [thread:$0]  %s16_s14, 256, %s18_s16, [#allocation4], %s233_s20, %s233_s20, %s234_s21  }
   0x6   :  { %s235_s22 = smov [#allocation6]  }
   0x7   :  { %s31_s23 = sshll.u32 %s235_s22, 4  ;;  %s32_s23 = int_to_ptr.vmem [resolvable:$true] %s31_s23 }
   0x8   :  { %34 = dma.hbm_to_vmem [thread:$0]  %s30_s19, 64, %s32_s23, [#allocation7]  }
   0x9   :  { %226 = dma.done.wait [#allocation4], 256  }
   0xa   :  { %227 = vsyncadd [#allocation4], 4294967040 }
   0xb   :  { %228 = dma.done.wait [#allocation7], 64  }
   0xc   :  { %229 = vsyncadd [#allocation7], 4294967232  ;;  %v51_v0 = vld [vmem:[#allocation3] sm:$0xff]  ;;  %v52_v1 = vld [vmem:[#allocation3 + $0x8] sm:$0xff]  ;;  %vm67_vm0 = vcmask 1043456   ;;  %vm49_vm1 = vcmask 25600   ;;  %v80_v15 = vlaneseq }
   0xd   :  { %56 = vst [vmem:[#allocation1] ss:$2 sm:$0xff] %v51_v0  ;;  %v236_v12 = vmov 0.0   ;;  %v94_v13 = vld [vmem:[#allocation6] sm:$0xf]  ;;  %vm84_vm2 = vcmask 1041409  }
   0xe   :  { %60 = vst [vmem:[#allocation1 + $0x10] ss:$2 sm:$0xff] %v52_v1  ;;  %145 = vmatpush.msk.msra.mxu0 %vm67_vm0, %v94_v13  ;;  %v81_v16 = vand.u32 127, %v80_v15  ;;  %vm99_vm3 = vcmask 31744   ;;  %v153_v24 = vld [vmem:[%s277_s2] ss:$0 sm:$0xff] }
   0xf   :  { %50 = vst.msk [vmem:[#allocation2] sm:$0x3] %vm49_vm1, %v236_v12  ;;  %s237_s24 = smov [#allocation8]   ;;  %s134_s28 = sshll.u32 %s278_s3, 4  ;;  %s135_s28 = int_to_ptr.hbm [resolvable:$true] %s134_s28 }
  0x10   :  { %s132_s25 = sshll.u32 %s237_s24, 4  ;;  %s133_s25 = int_to_ptr.vmem [resolvable:$true] %s132_s25 }
  0x14   :  { %v57_v2 = vld.sshfl [vmem:[#allocation1] sm:$0xff pattern:$0x75316420]  ;;  %v58_v3 = vld.sshfl [vmem:[#allocation1 + $0x8] sm:$0xff pattern:$0x75316420] }
  0x15   :  { %v68_v4 = vsel %vm67_vm0, %v57_v2, 0.0  ;;  %v69_v5 = vsel %vm67_vm0, %v58_v3, 0.0  ;;  %v61_v7 = vld.sshfl [vmem:[#allocation1 + $0x10] sm:$0xff pattern:$0x75316420] }
  0x16   :  { %v70_v6 = vadd.f32 %v69_v5, %v68_v4  ;;  %v62_v8 = vld.sshfl [vmem:[#allocation1 + $0x18] sm:$0xff pattern:$0x75316420]  ;;  %v73_v9 = vsel %vm67_vm0, %v61_v7, 0.0  ;;  %v53_v19 = vld [vmem:[#allocation2] sm:$0x3] }
  0x17   :  { %v74_v10 = vsel %vm67_vm0, %v62_v8, 0.0 }
  0x18   :  { %71 = vadd.xlane.f32.xlu0 %v70_v6  ;;  %v75_v11 = vadd.f32 %v74_v10, %v73_v9 }
  0x20   :  { %76 = vadd.xlane.f32.xlu0 %v75_v11 }
  0x8b   :  { %v72_v14 = vpop.xlane.xlu0 %71 }
  0x8c   :  { %v82_v18 = vperm.slane %v72_v14, %v81_v16 }
  0x93   :  { %v77_v17 = vpop.xlane.xlu0 %76 }
  0x94   :  { %v83_v20 = vperm.slane %v77_v17, %v81_v16 }
  0x96   :  { %v85_v21 = vsel %vm84_vm2, %v83_v20, %v82_v18 }
  0x97   :  { %v87_v22 = vadd.f32 %v85_v21, %v53_v19 }
  0x99   :  { %89 = vst.msk [vmem:[#allocation2] sm:$0x3] %vm49_vm1, %v87_v22 }
  0xa0   :  { %v93_v23 = vld [vmem:[#allocation2] sm:$0x3] }
  0xa1   :  { %146 = vmatmul.msk.f32.vlgmr.msra.gmra.mxu0 %vm99_vm3, %v93_v23 }
 0x11e   :  { %v123_v25 = vpop.f32.mrf.mxu0 }
 0x11f   :  { %v124_v26 = vadd.f32 %v153_v24, %v123_v25 }
 0x121   :  { %126 = vst [vmem:[#allocation8] sm:$0x3] %v124_v26 }
 0x122   :  { %137 = dma.vmem_to_hbm [thread:$0]  %s133_s25, 32, %s135_s28, [#allocation5]  }
 0x123   :  { %230 = dma.done.wait [#allocation5], 32  }
 0x124   :  { %231 = vsyncadd [#allocation5], 4294967264 }
 0x125   :  { %142 = vsyncpa [#allocation4], 1 }
 0x126   :  { %143 = vsyncpa [#allocation7], 1 }
 0x127   :  { %144 = vsyncpa [#allocation5], 1 }

</bundles_post_ra>
